<compile_context>
chip_gen: v6e
topology: v6e:2x2x1
jax: 0.10.0
libtpu: 0.0.40
codegen_flags: <defaults>
</compile_context>

<pallas_src>
import math
import functools

import jax
import jax.numpy as jnp
from jax.experimental import pallas as pl
from jax.experimental.pallas import tpu as pltpu

NEG_INF = -1e9  # matches the torch reference's masked_fill value (keep finite!)


def _pick_tile(dim, pref):
    """Largest 'nice' divisor of `dim` that is <= pref (full dim for toy shapes).

    Prefers multiples of 128 (lane-dense), then multiples of 8 (sublane-aligned),
    otherwise falls back to the full dimension (always legal)."""
    if dim <= pref:
        return dim
    best8 = None
    for t in range(pref, 0, -1):
        if dim % t == 0:
            if t % 128 == 0:
                return t
            if best8 is None and t % 8 == 0:
                best8 = t
    return best8 if best8 is not None else dim


# --------------------------- tiled linear kernel ------------------------------

def _linear_kernel(x_ref, w_ref, b_ref, o_ref, acc_ref):
    """Accumulating tiled matmul: o = x @ w + b (bf16 operands, f32 accumulator)."""
    k = pl.program_id(2)

    @pl.when(k == 0)
    def _():
        acc_ref[...] = jnp.zeros_like(acc_ref)

    acc_ref[...] += jnp.dot(x_ref[...], w_ref[...],
                            preferred_element_type=jnp.float32)

    @pl.when(k == pl.num_programs(2) - 1)
    def _():
        o_ref[...] = (acc_ref[...] + b_ref[...]).astype(o_ref.dtype)


def linear(x2d, w, b, *, out_dtype=jnp.bfloat16, tm=512, tn=512, tk=512):
    """x2d:(M,K) @ w:(K,N) + b:(N,) -> (M,N). bf16 inputs, f32 accumulation."""
    M, K = x2d.shape
    K2, N = w.shape
    assert K == K2
    tm = _pick_tile(M, tm)
    tn = _pick_tile(N, tn)
    tk = _pick_tile(K, tk)
    grid = (M // tm, N // tn, K // tk)
    return pl.pallas_call(
        _linear_kernel,
        out_shape=jax.ShapeDtypeStruct((M, N), out_dtype),
        grid_spec=pltpu.PrefetchScalarGridSpec(
            num_scalar_prefetch=0,
            grid=grid,
            in_specs=[
                pl.BlockSpec((tm, tk), lambda i, j, k: (i, k)),
                pl.BlockSpec((tk, tn), lambda i, j, k: (k, j)),
                pl.BlockSpec((1, tn), lambda i, j, k: (0, j)),
            ],
            out_specs=pl.BlockSpec((tm, tn), lambda i, j, k: (i, j)),
            scratch_shapes=[pltpu.VMEM((tm, tn), jnp.float32)],
        ),
        compiler_params=pltpu.CompilerParams(
            dimension_semantics=("parallel", "parallel", "arbitrary"),
            vmem_limit_bytes=64 * 1024 * 1024,
        ),
    )(x2d, w, b.reshape(1, N))


# ------------------------ flash-style attention kernel ------------------------

def _flash_kernel(q_ref, k_ref, v_ref, msk_ref, wo_ref, bo_ref, o_ref,
                  m_sc, l_sc, acc_sc, *, num_heads):
    """Online-softmax attention; heads are the leading batch dim of the block.

    q_ref:(H,tq,dk) k_ref,v_ref:(H,tk,dk) bf16, msk_ref:(tq,tk) int8,
    wo_ref:(H,dk,D) bf16, bo_ref:(1,D) f32, o_ref:(tq,D) f32.
    scratch: m_sc,l_sc:(H,tq,1) f32, acc_sc:(H,tq,dk) f32.
    Scale 1/sqrt(dk) is already folded into the Q projection weights.
    """
    ki = pl.program_id(2)

    @pl.when(ki == 0)
    def _():
        m_sc[...] = jnp.full_like(m_sc, -jnp.inf)
        l_sc[...] = jnp.zeros_like(l_sc)
        acc_sc[...] = jnp.zeros_like(acc_sc)

    q = q_ref[...]                       # (H, tq, dk) bf16 (pre-scaled)
    k = k_ref[...]                       # (H, tk, dk) bf16
    v = v_ref[...]                       # (H, tk, dk) bf16
    masked = msk_ref[...] != 0           # (tq, tk) bool, True = masked

    # Batched QK^T on the MXU, f32 accumulation.
    s = jnp.einsum("hqd,hkd->hqk", q, k,
                   preferred_element_type=jnp.float32)          # (H, tq, tk)
    s = jnp.where(masked[None, :, :], NEG_INF, s)

    # Online softmax (f32 state, whole-ref updates -> no masked column stores).
    m_prev = m_sc[...]                                           # (H, tq, 1)
    m_new = jnp.maximum(m_prev, jnp.max(s, axis=-1, keepdims=True))
    alpha = jnp.exp(m_prev - m_new)
    p = jnp.exp(s - m_new)                                       # (H, tq, tk)

    l_sc[...] = alpha * l_sc[...] + jnp.sum(p, axis=-1, keepdims=True)
    acc_sc[...] = alpha * acc_sc[...] + jnp.einsum(
        "hqk,hkd->hqd", p.astype(v.dtype), v,
        preferred_element_type=jnp.float32)
    m_sc[...] = m_new

    @pl.when(ki == pl.num_programs(2) - 1)
    def _():
        # Normalize the attention output in place (EUP reciprocal).
        acc_sc[...] = acc_sc[...] * pl.reciprocal(l_sc[...], approx=True)
        # Fused Wo projection + bias, accumulated through the (tq, D) f32
        # output VMEM block (no register-held (tq, D) value).
        o_ref[...] = jnp.broadcast_to(bo_ref[...], o_ref.shape)
        for h in range(num_heads):
            o_ref[...] += jnp.dot(acc_sc[h].astype(jnp.bfloat16), wo_ref[h],
                                  preferred_element_type=jnp.float32)


def flash_mha(q_in, k_in, v_in, mask_i8, wo_r, bo, *, num_heads, packed,
              tq_pref=256, tk_pref=256):
    """Flash attention with fused Wo.

    packed=True : q_in is the fused qkv tensor (3, B, H, T, dk); k_in/v_in unused
                  (the same tensor is passed three times with slab-selecting
                  index maps, so qkv is never split into three HBM tensors).
    packed=False: q_in:(B,H,Tq,dk), k_in,v_in:(B,H,Tk,dk).
    mask_i8: (Bm, Tq, Tk) int8, nonzero = masked. Returns (B, Tq, D) f32.
    """
    if packed:
        assert q_in.shape[0] == 3
        _, B, H, Tq, dk = q_in.shape
        Tk = Tq
    else:
        B, H, Tq, dk = q_in.shape
        Tk = k_in.shape[2]
    assert H == num_heads
    D = H * dk

    tq = _pick_tile(Tq, tq_pref)
    tk = _pick_tile(Tk, tk_pref)
    nq, nk = Tq // tq, Tk // tk

    Bm = mask_i8.shape[0]
    if Bm > 1:
        mask_map = lambda b, qi, ki: (b, qi, ki)
    else:
        mask_map = lambda b, qi, ki: (0, qi, ki)

    if packed:
        q_spec = pl.BlockSpec((None, None, H, tq, dk),
                              lambda b, qi, ki: (0, b, 0, qi, 0))
        k_spec = pl.BlockSpec((None, None, H, tk, dk),
                              lambda b, qi, ki: (1, b, 0, ki, 0))
        v_spec = pl.BlockSpec((None, None, H, tk, dk),
                              lambda b, qi, ki: (2, b, 0, ki, 0))
        operands = (q_in, q_in, q_in)
    else:
        q_spec = pl.BlockSpec((None, H, tq, dk),
                              lambda b, qi, ki: (b, 0, qi, 0))
        k_spec = pl.BlockSpec((None, H, tk, dk),
                              lambda b, qi, ki: (b, 0, ki, 0))
        v_spec = pl.BlockSpec((None, H, tk, dk),
                              lambda b, qi, ki: (b, 0, ki, 0))
        operands = (q_in, k_in, v_in)

    kernel = functools.partial(_flash_kernel, num_heads=num_heads)
    return pl.pallas_call(
        kernel,
        out_shape=jax.ShapeDtypeStruct((B, Tq, D), jnp.float32),
        grid_spec=pltpu.PrefetchScalarGridSpec(
            num_scalar_prefetch=0,
            grid=(B, nq, nk),
            in_specs=[
                q_spec, k_spec, v_spec,
                pl.BlockSpec((None, tq, tk), mask_map),
                pl.BlockSpec((H, dk, D), lambda b, qi, ki: (0, 0, 0)),
                pl.BlockSpec((1, D), lambda b, qi, ki: (0, 0)),
            ],
            out_specs=pl.BlockSpec((None, tq, D), lambda b, qi, ki: (b, qi, 0)),
            scratch_shapes=[
                pltpu.VMEM((H, tq, 1), jnp.float32),   # running max
                pltpu.VMEM((H, tq, 1), jnp.float32),   # running sum
                pltpu.VMEM((H, tq, dk), jnp.float32),  # per-head output acc
            ],
        ),
        compiler_params=pltpu.CompilerParams(
            dimension_semantics=("parallel", "parallel", "arbitrary"),
            vmem_limit_bytes=64 * 1024 * 1024,
        ),
    )(*operands, mask_i8, wo_r, bo)


# ------------------------------ module wrapper --------------------------------

def multi_head_attention(params, q, k, v, mask, *, num_heads,
                         self_attention=False):
    """Forward pass matching the PyTorch MultiHeadAttention module.

    `self_attention` must be set explicitly (the `q is k` identity check is
    always False under jit, so it cannot be used to detect the fused path).
    """
    B, Tq, D = q.shape
    Tk = k.shape[1]
    assert D % num_heads == 0
    dk = D // num_heads
    scale = 1.0 / math.sqrt(dk)

    # Fold 1/sqrt(dk) into the Q projection (exact; removes per-block scaling).
    wq_s = params["wq"] * scale
    bq_s = params["bq"] * scale

    wo_r = params["wo"].reshape(num_heads, dk, D).astype(jnp.bfloat16)
    bo = params["bo"].reshape(1, D).astype(jnp.float32)

    # Mask: un-broadcast int8 (Bm, Tq, Tk), nonzero = masked (boolean semantics).
    if mask is None:
        mask_i8 = jnp.zeros((1, Tq, Tk), jnp.int8)
    else:
        m = jnp.asarray(mask)
        if m.ndim == 4:
            assert m.shape[1] == 1, "per-head masks not supported"
            m = m[:, 0]
        elif m.ndim == 2:
            m = m[None]
        mask_i8 = m.astype(jnp.int8)

    # TODO(synk): nn.Dropout on attention probabilities is identity (eval/p=0).

    if self_attention:
        # One fused (D, 3D) projection launch; the packed qkv tensor is handed
        # to flash_mha directly (slab-selecting index maps), never sliced into
        # three separate HBM tensors.
        w_qkv = jnp.concatenate([wq_s, params["wk"], params["wv"]],
                                axis=1).astype(jnp.bfloat16)            # (D,3D)
        b_qkv = jnp.concatenate([bq_s, params["bk"], params["bv"]],
                                axis=0).astype(jnp.float32)             # (3D,)
        qkv = linear(q.reshape(B * Tq, D).astype(jnp.bfloat16),
                     w_qkv, b_qkv)                                      # bf16
        qkv_t = qkv.reshape(B, Tq, 3, num_heads, dk).transpose(2, 0, 3, 1, 4)
        return flash_mha(qkv_t, None, None, mask_i8, wo_r, bo,
                         num_heads=num_heads, packed=True)

    def proj(x, w, b, T):
        y = linear(x.reshape(B * T, D).astype(jnp.bfloat16),
                   w.astype(jnp.bfloat16), b.astype(jnp.float32))
        return y.reshape(B, T, num_heads, dk).transpose(0, 2, 1, 3)     # (B,H,T,dk)

    q_b = proj(q, wq_s, bq_s, Tq)
    k_b = proj(k, params["wk"], params["bk"], Tk)
    v_b = proj(v, params["wv"], params["bv"], Tk)
    return flash_mha(q_b, k_b, v_b, mask_i8, wo_r, bo,
                     num_heads=num_heads, packed=False)


# ------------------------------ reference (pure JAX) ---------------------------

def mha_reference(params, q, k, v, mask, num_heads):
    B, Tq, D = q.shape
    Tk = k.shape[1]
    dk = D // num_heads

    def proj(x, w, b):
        return x @ w + b

    qp = proj(q, params["wq"], params["bq"]).reshape(B, Tq, num_heads, dk).transpose(0, 2, 1, 3)
    kp = proj(k, params["wk"], params["bk"]).reshape(B, Tk, num_heads, dk).transpose(0, 2, 1, 3)
    vp = proj(v, params["wv"], params["bv"]).reshape(B, Tk, num_heads, dk).transpose(0, 2, 1, 3)
    s = jnp.einsum("bhqd,bhkd->bhqk", qp, kp) / math.sqrt(dk)
    if mask is not None:
        s = jnp.where(mask, NEG_INF, s)
    p = jax.nn.softmax(s, axis=-1)
    o = jnp.einsum("bhqk,bhkd->bhqd", p, vp).transpose(0, 2, 1, 3).reshape(B, Tq, D)
    return o @ params["wo"] + params["bo"]


# ------------------------------ params & main ----------------------------------

def init_mha_params(key, d_model):
    ks = jax.random.split(key, 8)
    xav = math.sqrt(6.0 / (d_model + d_model))
    bnd = 1.0 / math.sqrt(d_model)

    def w(k):
        return jax.random.uniform(k, (d_model, d_model), jnp.float32, -xav, xav)

    def b(k):
        return jax.random.uniform(k, (d_model,), jnp.float32, -bnd, bnd)

    return {"wq": w(ks[0]), "bq": b(ks[1]),
            "wk": w(ks[2]), "bk": b(ks[3]),
            "wv": w(ks[4]), "bv": b(ks[5]),
            "wo": w(ks[6]), "bo": b(ks[7])}


if __name__ == "__main__":
    d_model, num_heads = 32, 4
    B, T = 2, 8

    key = jax.random.PRNGKey(0)
    kp, kx = jax.random.split(key, 2)

    params = init_mha_params(kp, d_model)
    x = jax.random.normal(kx, (B, T, d_model), jnp.float32)

    # Causal mask (True = masked), broadcast over batch and heads: (1,1,T,T).
    mask = jnp.triu(jnp.ones((T, T), dtype=bool), k=1)[None, None]

    ref = mha_reference(params, x, x, x, mask, num_heads)

    # Self-attention: fused QKV projection + packed flash attention.
    mha_self = jax.jit(functools.partial(multi_head_attention,
                                         num_heads=num_heads,
                                         self_attention=True))
    out = jax.block_until_ready(mha_self(params, x, x, x, mask))
    assert out.shape == (B, T, d_model)
    assert bool(jnp.allclose(out, ref, rtol=3e-2, atol=3e-2)), \
        "self-attention mismatch vs reference"

    # Cross-attention path (separate projections) — same math, unfused QKV.
    mha_cross = jax.jit(functools.partial(multi_head_attention,
                                          num_heads=num_heads,
                                          self_attention=False))
    out2 = jax.block_until_ready(mha_cross(params, x, x, x, mask))
    assert bool(jnp.allclose(out2, ref, rtol=3e-2, atol=3e-2)), \
        "cross-attention mismatch vs reference"

    print("KERNEL_OK")
</pallas_src>

<mosaic_0001>
module attributes {stable_mosaic.version = 11 : i64} {
  func.func @_linear_kernel(%arg0: i32, %arg1: i32, %arg2: i32, %arg3: memref<16x32xbf16, #tpu.memory_space<vmem>>, %arg4: memref<32x96xbf16, #tpu.memory_space<vmem>>, %arg5: memref<1x96xf32, #tpu.memory_space<vmem>>, %arg6: memref<16x96xbf16, #tpu.memory_space<vmem>>, %arg7: memref<16x96xf32, #tpu.memory_space<vmem>>) attributes {dimension_semantics = [#tpu.dimension_semantics<parallel>, #tpu.dimension_semantics<parallel>, #tpu.dimension_semantics<arbitrary>], iteration_bounds = array<i64: 1, 1, 1>, scalar_prefetch = 0 : i64, scratch_operands = 1 : i64, tpu.core_type = #tpu.core_type<tc>, window_params = [{transform_indices = @transform_0, window_bounds = array<i64: 16, 32>}, {transform_indices = @transform_1, window_bounds = array<i64: 32, 96>}, {transform_indices = @transform_2, window_bounds = array<i64: 1, 96>}, {transform_indices = @transform_3, window_bounds = array<i64: 16, 96>}]} {
    %c0_i32 = arith.constant 0 : i32
    %0 = arith.cmpi eq, %arg2, %c0_i32 : i32
    %1 = arith.extui %0 : i1 to i32
    %c0_i32_0 = arith.constant 0 : i32
    %2 = arith.cmpi ne, %1, %c0_i32_0 : i32
    scf.if %2 {
      %cst_10 = arith.constant 0.000000e+00 : f32
      %12 = vector.broadcast %cst_10 : f32 to vector<16x96xf32>
      %c0_11 = arith.constant 0 : index
      %c0_12 = arith.constant 0 : index
      %13 = vector.load %arg7[%c0_11, %c0_12] : memref<16x96xf32, #tpu.memory_space<vmem>>, vector<16x96xf32>
      tpu.vector_store %arg7[%c0_11, %c0_12], %12 {strides = array<i32>} : memref<16x96xf32, #tpu.memory_space<vmem>>, vector<16x96xf32>,
    } else {
    }
    %c0 = arith.constant 0 : index
    %c0_1 = arith.constant 0 : index
    %3 = vector.load %arg7[%c0, %c0_1] : memref<16x96xf32, #tpu.memory_space<vmem>>, vector<16x96xf32>
    %c0_2 = arith.constant 0 : index
    %c0_3 = arith.constant 0 : index
    %4 = vector.load %arg3[%c0_2, %c0_3] : memref<16x32xbf16, #tpu.memory_space<vmem>>, vector<16x32xbf16>
    %c0_4 = arith.constant 0 : index
    %c0_5 = arith.constant 0 : index
    %5 = vector.load %arg4[%c0_4, %c0_5] : memref<32x96xbf16, #tpu.memory_space<vmem>>, vector<32x96xbf16>
    %cst = arith.constant dense<0.000000e+00> : vector<16x96xf32>
    %6 = tpu.matmul %4, %5, %cst {dimension_numbers = #tpu.dot_dimension_numbers<[1], [0], [0], [1], [0, 0, 1, 1], [], []>} : vector<16x32xbf16>, vector<32x96xbf16>, vector<16x96xf32> -> vector<16x96xf32>
    %7 = arith.addf %3, %6 : vector<16x96xf32>
    %c0_6 = arith.constant 0 : index
    %c0_7 = arith.constant 0 : index
    %8 = vector.load %arg7[%c0_6, %c0_7] : memref<16x96xf32, #tpu.memory_space<vmem>>, vector<16x96xf32>
    tpu.vector_store %arg7[%c0_6, %c0_7], %7 {strides = array<i32>} : memref<16x96xf32, #tpu.memory_space<vmem>>, vector<16x96xf32>,
    %c0_i32_8 = arith.constant 0 : i32
    %9 = arith.cmpi eq, %arg2, %c0_i32_8 : i32
    %10 = arith.extui %9 : i1 to i32
    %c0_i32_9 = arith.constant 0 : i32
    %11 = arith.cmpi ne, %10, %c0_i32_9 : i32
    scf.if %11 {
      %c0_10 = arith.constant 0 : index
      %c0_11 = arith.constant 0 : index
      %12 = vector.load %arg7[%c0_10, %c0_11] : memref<16x96xf32, #tpu.memory_space<vmem>>, vector<16x96xf32>
      %c0_12 = arith.constant 0 : index
      %c0_13 = arith.constant 0 : index
      %13 = vector.load %arg5[%c0_12, %c0_13] : memref<1x96xf32, #tpu.memory_space<vmem>>, vector<1x96xf32>
      %14 = vector.broadcast %13 : vector<1x96xf32> to vector<16x96xf32>
      %15 = arith.addf %12, %14 : vector<16x96xf32>
      %16 = arith.truncf %15 : vector<16x96xf32> to vector<16x96xbf16>
      %c0_14 = arith.constant 0 : index
      %c0_15 = arith.constant 0 : index
      %17 = vector.load %arg6[%c0_14, %c0_15] : memref<16x96xbf16, #tpu.memory_space<vmem>>, vector<16x96xbf16>
      tpu.vector_store %arg6[%c0_14, %c0_15], %16 {strides = array<i32>} : memref<16x96xbf16, #tpu.memory_space<vmem>>, vector<16x96xbf16>,
    } else {
    }
    return
  }
  func.func @transform_0(%arg0: i32, %arg1: i32, %arg2: i32) -> (i32, i32) {
    %c0_i32 = arith.constant 0 : i32
    return %arg0, %arg2 : i32, i32
  }
  func.func @transform_1(%arg0: i32, %arg1: i32, %arg2: i32) -> (i32, i32) {
    %c0_i32 = arith.constant 0 : i32
    return %arg2, %arg1 : i32, i32
  }
  func.func @transform_2(%arg0: i32, %arg1: i32, %arg2: i32) -> (i32, i32) {
    %c0_i32 = arith.constant 0 : i32
    %c0_i32_0 = arith.constant 0 : i32
    return %c0_i32, %arg1 : i32, i32
  }
  func.func @transform_3(%arg0: i32, %arg1: i32, %arg2: i32) -> (i32, i32) {
    %c0_i32 = arith.constant 0 : i32
    return %arg0, %arg1 : i32, i32
  }
}

module attributes {stable_mosaic.version = 11 : i64} {
  func.func @_flash_kernel(%arg0: i32, %arg1: i32, %arg2: i32, %arg3: memref<1x1x4x8x8xbf16, #tpu.memory_space<vmem>>, %arg4: memref<1x1x4x8x8xbf16, #tpu.memory_space<vmem>>, %arg5: memref<1x1x4x8x8xbf16, #tpu.memory_space<vmem>>, %arg6: memref<1x8x8xi8, #tpu.memory_space<vmem>>, %arg7: memref<4x8x32xbf16, #tpu.memory_space<vmem>>, %arg8: memref<1x32xf32, #tpu.memory_space<vmem>>, %arg9: memref<1x8x32xf32, #tpu.memory_space<vmem>>, %arg10: memref<4x8x1xf32, #tpu.memory_space<vmem>>, %arg11: memref<4x8x1xf32, #tpu.memory_space<vmem>>, %arg12: memref<4x8x8xf32, #tpu.memory_space<vmem>>) attributes {dimension_semantics = [#tpu.dimension_semantics<parallel>, #tpu.dimension_semantics<parallel>, #tpu.dimension_semantics<arbitrary>], iteration_bounds = array<i64: 2, 1, 1>, scalar_prefetch = 0 : i64, scratch_operands = 3 : i64, tpu.core_type = #tpu.core_type<tc>, window_params = [{transform_indices = @transform_0, window_bounds = array<i64: 1, 1, 4, 8, 8>}, {transform_indices = @transform_1, window_bounds = array<i64: 1, 1, 4, 8, 8>}, {transform_indices = @transform_2, window_bounds = array<i64: 1, 1, 4, 8, 8>}, {transform_indices = @transform_3, window_bounds = array<i64: 1, 8, 8>}, {pipeline_mode = #tpu.pipeline_mode<synchronous>, transform_indices = @transform_4, window_bounds = array<i64: 4, 8, 32>}, {pipeline_mode = #tpu.pipeline_mode<synchronous>, transform_indices = @transform_5, window_bounds = array<i64: 1, 32>}, {transform_indices = @transform_6, window_bounds = array<i64: 1, 8, 32>}]} {
    %c0_i32 = arith.constant 0 : i32
    %0 = arith.cmpi eq, %arg2, %c0_i32 : i32
    %1 = arith.extui %0 : i1 to i32
    %c0_i32_0 = arith.constant 0 : i32
    %2 = arith.cmpi ne, %1, %c0_i32_0 : i32
    scf.if %2 {
      %cst_42 = arith.constant 0xFF800000 : f32
      %45 = vector.broadcast %cst_42 : f32 to vector<4x8x1xf32>
      %c0_43 = arith.constant 0 : index
      %c0_44 = arith.constant 0 : index
      %c0_45 = arith.constant 0 : index
      %46 = vector.load %arg10[%c0_43, %c0_44, %c0_45] : memref<4x8x1xf32, #tpu.memory_space<vmem>>, vector<4x8x1xf32>
      tpu.vector_store %arg10[%c0_43, %c0_44, %c0_45], %45 {strides = array<i32>} : memref<4x8x1xf32, #tpu.memory_space<vmem>>, vector<4x8x1xf32>,
      %cst_46 = arith.constant 0.000000e+00 : f32
      %47 = vector.broadcast %cst_46 : f32 to vector<4x8x1xf32>
      %c0_47 = arith.constant 0 : index
      %c0_48 = arith.constant 0 : index
      %c0_49 = arith.constant 0 : index
      %48 = vector.load %arg11[%c0_47, %c0_48, %c0_49] : memref<4x8x1xf32, #tpu.memory_space<vmem>>, vector<4x8x1xf32>
      tpu.vector_store %arg11[%c0_47, %c0_48, %c0_49], %47 {strides = array<i32>} : memref<4x8x1xf32, #tpu.memory_space<vmem>>, vector<4x8x1xf32>,
      %cst_50 = arith.constant 0.000000e+00 : f32
      %49 = vector.broadcast %cst_50 : f32 to vector<4x8x8xf32>
      %c0_51 = arith.constant 0 : index
      %c0_52 = arith.constant 0 : index
      %c0_53 = arith.constant 0 : index
      %50 = vector.load %arg12[%c0_51, %c0_52, %c0_53] : memref<4x8x8xf32, #tpu.memory_space<vmem>>, vector<4x8x8xf32>
      tpu.vector_store %arg12[%c0_51, %c0_52, %c0_53], %49 {strides = array<i32>} : memref<4x8x8xf32, #tpu.memory_space<vmem>>, vector<4x8x8xf32>,
    } else {
    }
    %c0 = arith.constant 0 : index
    %c0_1 = arith.constant 0 : index
    %c0_2 = arith.constant 0 : index
    %c0_3 = arith.constant 0 : index
    %c0_4 = arith.constant 0 : index
    %3 = vector.load %arg3[%c0, %c0_1, %c0_2, %c0_3, %c0_4] : memref<1x1x4x8x8xbf16, #tpu.memory_space<vmem>>, vector<1x1x4x8x8xbf16>
    %4 = vector.shape_cast %3 : vector<1x1x4x8x8xbf16> to vector<4x8x8xbf16>
    %c0_5 = arith.constant 0 : index
    %c0_6 = arith.constant 0 : index
    %c0_7 = arith.constant 0 : index
    %c0_8 = arith.constant 0 : index
    %c0_9 = arith.constant 0 : index
    %5 = vector.load %arg4[%c0_5, %c0_6, %c0_7, %c0_8, %c0_9] : memref<1x1x4x8x8xbf16, #tpu.memory_space<vmem>>, vector<1x1x4x8x8xbf16>
    %6 = vector.shape_cast %5 : vector<1x1x4x8x8xbf16> to vector<4x8x8xbf16>
    %c0_10 = arith.constant 0 : index
    %c0_11 = arith.constant 0 : index
    %c0_12 = arith.constant 0 : index
    %c0_13 = arith.constant 0 : index
    %c0_14 = arith.constant 0 : index
    %7 = vector.load %arg5[%c0_10, %c0_11, %c0_12, %c0_13, %c0_14] : memref<1x1x4x8x8xbf16, #tpu.memory_space<vmem>>, vector<1x1x4x8x8xbf16>
    %8 = vector.shape_cast %7 : vector<1x1x4x8x8xbf16> to vector<4x8x8xbf16>
    %c0_15 = arith.constant 0 : index
    %c0_16 = arith.constant 0 : index
    %c0_17 = arith.constant 0 : index
    %9 = vector.load %arg6[%c0_15, %c0_16, %c0_17] : memref<1x8x8xi8, #tpu.memory_space<vmem>>, vector<1x8x8xi8>
    %10 = vector.shape_cast %9 : vector<1x8x8xi8> to vector<8x8xi8>
    %c0_i8 = arith.constant 0 : i8
    %11 = vector.broadcast %c0_i8 : i8 to vector<8x8xi8>
    %12 = arith.cmpi ne, %10, %11 : vector<8x8xi8>
    "tpu.trace_start"() <{level = 10 : i32, message = "hqd,hkd->hqk"}> : () -> ()
    %cst = arith.constant dense<0.000000e+00> : vector<4x8x8xf32>
    %13 = tpu.matmul %4, %6, %cst {dimension_numbers = #tpu.dot_dimension_numbers<[2], [2], [1], [1], [0, 0, 0, 1, 1, 1], [0], [0]>} : vector<4x8x8xbf16>, vector<4x8x8xbf16>, vector<4x8x8xf32> -> vector<4x8x8xf32>
    "tpu.trace_stop"() : () -> ()
    %14 = vector.shape_cast %12 : vector<8x8xi1> to vector<1x8x8xi1>
    %cst_18 = arith.constant -1.000000e+09 : f32
    %15 = vector.shape_cast %14 : vector<1x8x8xi1> to vector<1x8x8xi1>
    %16 = vector.broadcast %15 : vector<1x8x8xi1> to vector<4x8x8xi1>
    %17 = vector.broadcast %cst_18 : f32 to vector<4x8x8xf32>
    %18 = arith.select %16, %17, %13 : vector<4x8x8xi1>, vector<4x8x8xf32>
    %c0_19 = arith.constant 0 : index
    %c0_20 = arith.constant 0 : index
    %c0_21 = arith.constant 0 : index
    %19 = vector.load %arg10[%c0_19, %c0_20, %c0_21] : memref<4x8x1xf32, #tpu.memory_space<vmem>>, vector<4x8x1xf32>
    %cst_22 = arith.constant dense<0xFF800000> : vector<4x8xf32>
    %20 = vector.multi_reduction <maximumf>, %18, %cst_22 [2] : vector<4x8x8xf32> to vector<4x8xf32>
    %21 = vector.shape_cast %20 : vector<4x8xf32> to vector<4x8x1xf32>
    %22 = arith.maximumf %19, %21 : vector<4x8x1xf32>
    %23 = arith.subf %19, %22 : vector<4x8x1xf32>
    %24 = math.exp %23 : vector<4x8x1xf32>
    %25 = vector.broadcast %22 : vector<4x8x1xf32> to vector<4x8x8xf32>
    %26 = arith.subf %18, %25 : vector<4x8x8xf32>
    %27 = math.exp %26 : vector<4x8x8xf32>
    %c0_23 = arith.constant 0 : index
    %c0_24 = arith.constant 0 : index
    %c0_25 = arith.constant 0 : index
    %28 = vector.load %arg11[%c0_23, %c0_24, %c0_25] : memref<4x8x1xf32, #tpu.memory_space<vmem>>, vector<4x8x1xf32>
    %29 = arith.mulf %24, %28 : vector<4x8x1xf32>
    %cst_26 = arith.constant dense<0.000000e+00> : vector<4x8xf32>
    %30 = vector.multi_reduction <add>, %27, %cst_26 [2] : vector<4x8x8xf32> to vector<4x8xf32>
    %31 = vector.shape_cast %30 : vector<4x8xf32> to vector<4x8x1xf32>
    %32 = arith.addf %29, %31 : vector<4x8x1xf32>
    %c0_27 = arith.constant 0 : index
    %c0_28 = arith.constant 0 : index
    %c0_29 = arith.constant 0 : index
    %33 = vector.load %arg11[%c0_27, %c0_28, %c0_29] : memref<4x8x1xf32, #tpu.memory_space<vmem>>, vector<4x8x1xf32>
    tpu.vector_store %arg11[%c0_27, %c0_28, %c0_29], %32 {strides = array<i32>} : memref<4x8x1xf32, #tpu.memory_space<vmem>>, vector<4x8x1xf32>,
    %c0_30 = arith.constant 0 : index
    %c0_31 = arith.constant 0 : index
    %c0_32 = arith.constant 0 : index
    %34 = vector.load %arg12[%c0_30, %c0_31, %c0_32] : memref<4x8x8xf32, #tpu.memory_space<vmem>>, vector<4x8x8xf32>
    %35 = vector.broadcast %24 : vector<4x8x1xf32> to vector<4x8x8xf32>
    %36 = arith.mulf %35, %34 : vector<4x8x8xf32>
    %37 = arith.truncf %27 : vector<4x8x8xf32> to vector<4x8x8xbf16>
    "tpu.trace_start"() <{level = 10 : i32, message = "hqk,hkd->hqd"}> : () -> ()
    %cst_33 = arith.constant dense<0.000000e+00> : vector<4x8x8xf32>
    %38 = tpu.matmul %37, %8, %cst_33 {dimension_numbers = #tpu.dot_dimension_numbers<[2], [1], [1], [2], [0, 0, 0, 1, 1, 2], [0], [0]>} : vector<4x8x8xbf16>, vector<4x8x8xbf16>, vector<4x8x8xf32> -> vector<4x8x8xf32>
    "tpu.trace_stop"() : () -> ()
    %39 = arith.addf %36, %38 : vector<4x8x8xf32>
    %c0_34 = arith.constant 0 : index
    %c0_35 = arith.constant 0 : index
    %c0_36 = arith.constant 0 : index
    %40 = vector.load %arg12[%c0_34, %c0_35, %c0_36] : memref<4x8x8xf32, #tpu.memory_space<vmem>>, vector<4x8x8xf32>
    tpu.vector_store %arg12[%c0_34, %c0_35, %c0_36], %39 {strides = array<i32>} : memref<4x8x8xf32, #tpu.memory_space<vmem>>, vector<4x8x8xf32>,
    %c0_37 = arith.constant 0 : index
    %c0_38 = arith.constant 0 : index
    %c0_39 = arith.constant 0 : index
    %41 = vector.load %arg10[%c0_37, %c0_38, %c0_39] : memref<4x8x1xf32, #tpu.memory_space<vmem>>, vector<4x8x1xf32>
    tpu.vector_store %arg10[%c0_37, %c0_38, %c0_39], %22 {strides = array<i32>} : memref<4x8x1xf32, #tpu.memory_space<vmem>>, vector<4x8x1xf32>,
    %c0_i32_40 = arith.constant 0 : i32
    %42 = arith.cmpi eq, %arg2, %c0_i32_40 : i32
    %43 = arith.extui %42 : i1 to i32
    %c0_i32_41 = arith.constant 0 : i32
    %44 = arith.cmpi ne, %43, %c0_i32_41 : i32
    scf.if %44 {
      %c0_42 = arith.constant 0 : index
      %c0_43 = arith.constant 0 : index
      %c0_44 = arith.constant 0 : index
      %45 = vector.load %arg12[%c0_42, %c0_43, %c0_44] : memref<4x8x8xf32, #tpu.memory_space<vmem>>, vector<4x8x8xf32>
      %c0_45 = arith.constant 0 : index
      %c0_46 = arith.constant 0 : index
      %c0_47 = arith.constant 0 : index
      %46 = vector.load %arg11[%c0_45, %c0_46, %c0_47] : memref<4x8x1xf32, #tpu.memory_space<vmem>>, vector<4x8x1xf32>
      %47 = tpu.reciprocal %46 {approx = true} : vector<4x8x1xf32> -> vector<4x8x1xf32>
      %48 = vector.broadcast %47 : vector<4x8x1xf32> to vector<4x8x8xf32>
      %49 = arith.mulf %45, %48 : vector<4x8x8xf32>
      %c0_48 = arith.constant 0 : index
      %c0_49 = arith.constant 0 : index
      %c0_50 = arith.constant 0 : index
      %50 = vector.load %arg12[%c0_48, %c0_49, %c0_50] : memref<4x8x8xf32, #tpu.memory_space<vmem>>, vector<4x8x8xf32>
      tpu.vector_store %arg12[%c0_48, %c0_49, %c0_50], %49 {strides = array<i32>} : memref<4x8x8xf32, #tpu.memory_space<vmem>>, vector<4x8x8xf32>,
      %c0_51 = arith.constant 0 : index
      %c0_52 = arith.constant 0 : index
      %51 = vector.load %arg8[%c0_51, %c0_52] : memref<1x32xf32, #tpu.memory_space<vmem>>, vector<1x32xf32>
      %52 = vector.shape_cast %51 : vector<1x32xf32> to vector<1x32xf32>
      %53 = vector.broadcast %52 : vector<1x32xf32> to vector<8x32xf32>
      %c0_53 = arith.constant 0 : index
      %c0_54 = arith.constant 0 : index
      %c0_55 = arith.constant 0 : index
      %54 = vector.load %arg9[%c0_53, %c0_54, %c0_55] : memref<1x8x32xf32, #tpu.memory_space<vmem>>, vector<1x8x32xf32>
      %55 = vector.shape_cast %54 : vector<1x8x32xf32> to vector<8x32xf32>
      %56 = vector.shape_cast %53 : vector<8x32xf32> to vector<1x8x32xf32>
      tpu.vector_store %arg9[%c0_53, %c0_54, %c0_55], %56 {strides = array<i32>} : memref<1x8x32xf32, #tpu.memory_space<vmem>>, vector<1x8x32xf32>,
      %c0_56 = arith.constant 0 : index
      %c0_57 = arith.constant 0 : index
      %c0_58 = arith.constant 0 : index
      %57 = vector.load %arg9[%c0_56, %c0_57, %c0_58] : memref<1x8x32xf32, #tpu.memory_space<vmem>>, vector<1x8x32xf32>
      %58 = vector.shape_cast %57 : vector<1x8x32xf32> to vector<8x32xf32>
      %c0_59 = arith.constant 0 : index
      %c0_60 = arith.constant 0 : index
      %c0_61 = arith.constant 0 : index
      %59 = vector.load %arg12[%c0_59, %c0_60, %c0_61] : memref<4x8x8xf32, #tpu.memory_space<vmem>>, vector<1x8x8xf32>
      %60 = vector.shape_cast %59 : vector<1x8x8xf32> to vector<8x8xf32>
      %61 = arith.truncf %60 : vector<8x8xf32> to vector<8x8xbf16>
      %c0_62 = arith.constant 0 : index
      %c0_63 = arith.constant 0 : index
      %c0_64 = arith.constant 0 : index
      %62 = vector.load %arg7[%c0_62, %c0_63, %c0_64] : memref<4x8x32xbf16, #tpu.memory_space<vmem>>, vector<1x8x32xbf16>
      %63 = vector.shape_cast %62 : vector<1x8x32xbf16> to vector<8x32xbf16>
      %cst_65 = arith.constant dense<0.000000e+00> : vector<8x32xf32>
      %64 = tpu.matmul %61, %63, %cst_65 {dimension_numbers = #tpu.dot_dimension_numbers<[1], [0], [0], [1], [0, 0, 1, 1], [], []>} : vector<8x8xbf16>, vector<8x32xbf16>, vector<8x32xf32> -> vector<8x32xf32>
      %65 = arith.addf %58, %64 : vector<8x32xf32>
      %c0_66 = arith.constant 0 : index
      %c0_67 = arith.constant 0 : index
      %c0_68 = arith.constant 0 : index
      %66 = vector.load %arg9[%c0_66, %c0_67, %c0_68] : memref<1x8x32xf32, #tpu.memory_space<vmem>>, vector<1x8x32xf32>
      %67 = vector.shape_cast %66 : vector<1x8x32xf32> to vector<8x32xf32>
      %68 = vector.shape_cast %65 : vector<8x32xf32> to vector<1x8x32xf32>
      tpu.vector_store %arg9[%c0_66, %c0_67, %c0_68], %68 {strides = array<i32>} : memref<1x8x32xf32, #tpu.memory_space<vmem>>, vector<1x8x32xf32>,
      %c0_69 = arith.constant 0 : index
      %c0_70 = arith.constant 0 : index
      %c0_71 = arith.constant 0 : index
      %69 = vector.load %arg9[%c0_69, %c0_70, %c0_71] : memref<1x8x32xf32, #tpu.memory_space<vmem>>, vector<1x8x32xf32>
      %70 = vector.shape_cast %69 : vector<1x8x32xf32> to vector<8x32xf32>
      %c1 = arith.constant 1 : index
      %c0_72 = arith.constant 0 : index
      %c0_73 = arith.constant 0 : index
      %71 = vector.load %arg12[%c1, %c0_72, %c0_73] : memref<4x8x8xf32, #tpu.memory_space<vmem>>, vector<1x8x8xf32>
      %72 = vector.shape_cast %71 : vector<1x8x8xf32> to vector<8x8xf32>
      %73 = arith.truncf %72 : vector<8x8xf32> to vector<8x8xbf16>
      %c1_74 = arith.constant 1 : index
      %c0_75 = arith.constant 0 : index
      %c0_76 = arith.constant 0 : index
      %74 = vector.load %arg7[%c1_74, %c0_75, %c0_76] : memref<4x8x32xbf16, #tpu.memory_space<vmem>>, vector<1x8x32xbf16>
      %75 = vector.shape_cast %74 : vector<1x8x32xbf16> to vector<8x32xbf16>
      %cst_77 = arith.constant dense<0.000000e+00> : vector<8x32xf32>
      %76 = tpu.matmul %73, %75, %cst_77 {dimension_numbers = #tpu.dot_dimension_numbers<[1], [0], [0], [1], [0, 0, 1, 1], [], []>} : vector<8x8xbf16>, vector<8x32xbf16>, vector<8x32xf32> -> vector<8x32xf32>
      %77 = arith.addf %70, %76 : vector<8x32xf32>
      %c0_78 = arith.constant 0 : index
      %c0_79 = arith.constant 0 : index
      %c0_80 = arith.constant 0 : index
      %78 = vector.load %arg9[%c0_78, %c0_79, %c0_80] : memref<1x8x32xf32, #tpu.memory_space<vmem>>, vector<1x8x32xf32>
      %79 = vector.shape_cast %78 : vector<1x8x32xf32> to vector<8x32xf32>
      %80 = vector.shape_cast %77 : vector<8x32xf32> to vector<1x8x32xf32>
      tpu.vector_store %arg9[%c0_78, %c0_79, %c0_80], %80 {strides = array<i32>} : memref<1x8x32xf32, #tpu.memory_space<vmem>>, vector<1x8x32xf32>,
      %c0_81 = arith.constant 0 : index
      %c0_82 = arith.constant 0 : index
      %c0_83 = arith.constant 0 : index
      %81 = vector.load %arg9[%c0_81, %c0_82, %c0_83] : memref<1x8x32xf32, #tpu.memory_space<vmem>>, vector<1x8x32xf32>
      %82 = vector.shape_cast %81 : vector<1x8x32xf32> to vector<8x32xf32>
      %c2 = arith.constant 2 : index
      %c0_84 = arith.constant 0 : index
      %c0_85 = arith.constant 0 : index
      %83 = vector.load %arg12[%c2, %c0_84, %c0_85] : memref<4x8x8xf32, #tpu.memory_space<vmem>>, vector<1x8x8xf32>
      %84 = vector.shape_cast %83 : vector<1x8x8xf32> to vector<8x8xf32>
      %85 = arith.truncf %84 : vector<8x8xf32> to vector<8x8xbf16>
      %c2_86 = arith.constant 2 : index
      %c0_87 = arith.constant 0 : index
      %c0_88 = arith.constant 0 : index
      %86 = vector.load %arg7[%c2_86, %c0_87, %c0_88] : memref<4x8x32xbf16, #tpu.memory_space<vmem>>, vector<1x8x32xbf16>
      %87 = vector.shape_cast %86 : vector<1x8x32xbf16> to vector<8x32xbf16>
      %cst_89 = arith.constant dense<0.000000e+00> : vector<8x32xf32>
      %88 = tpu.matmul %85, %87, %cst_89 {dimension_numbers = #tpu.dot_dimension_numbers<[1], [0], [0], [1], [0, 0, 1, 1], [], []>} : vector<8x8xbf16>, vector<8x32xbf16>, vector<8x32xf32> -> vector<8x32xf32>
      %89 = arith.addf %82, %88 : vector<8x32xf32>
      %c0_90 = arith.constant 0 : index
      %c0_91 = arith.constant 0 : index
      %c0_92 = arith.constant 0 : index
      %90 = vector.load %arg9[%c0_90, %c0_91, %c0_92] : memref<1x8x32xf32, #tpu.memory_space<vmem>>, vector<1x8x32xf32>
      %91 = vector.shape_cast %90 : vector<1x8x32xf32> to vector<8x32xf32>
      %92 = vector.shape_cast %89 : vector<8x32xf32> to vector<1x8x32xf32>
      tpu.vector_store %arg9[%c0_90, %c0_91, %c0_92], %92 {strides = array<i32>} : memref<1x8x32xf32, #tpu.memory_space<vmem>>, vector<1x8x32xf32>,
      %c0_93 = arith.constant 0 : index
      %c0_94 = arith.constant 0 : index
      %c0_95 = arith.constant 0 : index
      %93 = vector.load %arg9[%c0_93, %c0_94, %c0_95] : memref<1x8x32xf32, #tpu.memory_space<vmem>>, vector<1x8x32xf32>
      %94 = vector.shape_cast %93 : vector<1x8x32xf32> to vector<8x32xf32>
      %c3 = arith.constant 3 : index
      %c0_96 = arith.constant 0 : index
      %c0_97 = arith.constant 0 : index
      %95 = vector.load %arg12[%c3, %c0_96, %c0_97] : memref<4x8x8xf32, #tpu.memory_space<vmem>>, vector<1x8x8xf32>
      %96 = vector.shape_cast %95 : vector<1x8x8xf32> to vector<8x8xf32>
      %97 = arith.truncf %96 : vector<8x8xf32> to vector<8x8xbf16>
      %c3_98 = arith.constant 3 : index
      %c0_99 = arith.constant 0 : index
      %c0_100 = arith.constant 0 : index
      %98 = vector.load %arg7[%c3_98, %c0_99, %c0_100] : memref<4x8x32xbf16, #tpu.memory_space<vmem>>, vector<1x8x32xbf16>
      %99 = vector.shape_cast %98 : vector<1x8x32xbf16> to vector<8x32xbf16>
      %cst_101 = arith.constant dense<0.000000e+00> : vector<8x32xf32>
      %100 = tpu.matmul %97, %99, %cst_101 {dimension_numbers = #tpu.dot_dimension_numbers<[1], [0], [0], [1], [0, 0, 1, 1], [], []>} : vector<8x8xbf16>, vector<8x32xbf16>, vector<8x32xf32> -> vector<8x32xf32>
      %101 = arith.addf %94, %100 : vector<8x32xf32>
      %c0_102 = arith.constant 0 : index
      %c0_103 = arith.constant 0 : index
      %c0_104 = arith.constant 0 : index
      %102 = vector.load %arg9[%c0_102, %c0_103, %c0_104] : memref<1x8x32xf32, #tpu.memory_space<vmem>>, vector<1x8x32xf32>
      %103 = vector.shape_cast %102 : vector<1x8x32xf32> to vector<8x32xf32>
      %104 = vector.shape_cast %101 : vector<8x32xf32> to vector<1x8x32xf32>
      tpu.vector_store %arg9[%c0_102, %c0_103, %c0_104], %104 {strides = array<i32>} : memref<1x8x32xf32, #tpu.memory_space<vmem>>, vector<1x8x32xf32>,
    } else {
    }
    return
  }
  func.func @transform_0(%arg0: i32, %arg1: i32, %arg2: i32) -> (i32, i32, i32, i32, i32) {
    %c0_i32 = arith.constant 0 : i32
    %c0_i32_0 = arith.constant 0 : i32
    %c0_i32_1 = arith.constant 0 : i32
    %c0_i32_2 = arith.constant 0 : i32
    return %c0_i32, %arg0, %c0_i32_0, %arg1, %c0_i32_1 : i32, i32, i32, i32, i32
  }
  func.func @transform_1(%arg0: i32, %arg1: i32, %arg2: i32) -> (i32, i32, i32, i32, i32) {
    %c1_i32 = arith.constant 1 : i32
    %c0_i32 = arith.constant 0 : i32
    %c0_i32_0 = arith.constant 0 : i32
    %c0_i32_1 = arith.constant 0 : i32
    return %c1_i32, %arg0, %c0_i32, %arg2, %c0_i32_0 : i32, i32, i32, i32, i32
  }
  func.func @transform_2(%arg0: i32, %arg1: i32, %arg2: i32) -> (i32, i32, i32, i32, i32) {
    %c2_i32 = arith.constant 2 : i32
    %c0_i32 = arith.constant 0 : i32
    %c0_i32_0 = arith.constant 0 : i32
    %c0_i32_1 = arith.constant 0 : i32
    return %c2_i32, %arg0, %c0_i32, %arg2, %c0_i32_0 : i32, i32, i32, i32, i32
  }
  func.func @transform_3(%arg0: i32, %arg1: i32, %arg2: i32) -> (i32, i32, i32) {
    %c0_i32 = arith.constant 0 : i32
    %c0_i32_0 = arith.constant 0 : i32
    return %c0_i32, %arg1, %arg2 : i32, i32, i32
  }
  func.func @transform_4(%arg0: i32, %arg1: i32, %arg2: i32) -> (i32, i32, i32) {
    %c0_i32 = arith.constant 0 : i32
    %c0_i32_0 = arith.constant 0 : i32
    %c0_i32_1 = arith.constant 0 : i32
    %c0_i32_2 = arith.constant 0 : i32
    return %c0_i32, %c0_i32_0, %c0_i32_1 : i32, i32, i32
  }
  func.func @transform_5(%arg0: i32, %arg1: i32, %arg2: i32) -> (i32, i32) {
    %c0_i32 = arith.constant 0 : i32
    %c0_i32_0 = arith.constant 0 : i32
    %c0_i32_1 = arith.constant 0 : i32
    return %c0_i32, %c0_i32_0 : i32, i32
  }
  func.func @transform_6(%arg0: i32, %arg1: i32, %arg2: i32) -> (i32, i32, i32) {
    %c0_i32 = arith.constant 0 : i32
    %c0_i32_0 = arith.constant 0 : i32
    return %arg0, %arg1, %c0_i32 : i32, i32, i32
  }
}

</mosaic_0001>

<bundles_post_ra>
// kernel: multi_head_attention.2
= control target key start
LH: loop header
LB: loop body
LE: loop exit
PB: predicated region body
PF: predicated region fallthrough
CT: control target
= control target key end

     0   :  { %vm19_vm0 = vcmask 785408   ;;  %v151_v0 = vmov 0.0   ;;  %vm152_vm1 = vmmov 0   ;;  %vm47_vm2 = vcmask 261120   ;;  %s195_s1 = inlined_call_operand.vmem [shape: bf16[32,96], index: 1, kind: input, shape index: {}]   ;;  %s196_s0 = inlined_call_operand.vmem [shape: bf16[16,32], index: 0, kind: input, shape index: {}]   ;;  %s197_s2 = inlined_call_operand.vmem [shape: f32[1,96], index: 2, kind: input, shape index: {}]   ;;  %s198_s3 = inlined_call_operand.vmem [shape: bf16[16,96], index: 3, kind: output, shape index: {}]  }
   0x1   :  { %138 = vmatprep.subr.bf16.mxu0 %v151_v0  ;;  %v148_v1 = vld [vmem:[%s195_s1 + $0x8] sm:$0xff]   ;;  %142 = vmatprep.mubr.msk.bf16.mxu0 %vm152_vm1, %v151_v0  ;;  %20 = vst.msk [vmem:[#allocation2] sm:$0xff] %vm19_vm0, %v151_v0  ;;  %21 = vst.msk [vmem:[#allocation2 + $0x8] sm:$0xff] %vm19_vm0, %v151_v0  ;;  %v149_v2 = vld [vmem:[%s195_s1] sm:$0xff]   ;;  %vm119_vm3 = vcmask 781312  }
   0x2   :  { %139 = vmatpush3.bf16.msra.mxu0 %v148_v1  ;;  %v150_v3 = vld [vmem:[%s196_s0] sm:$0xff]  }
   0x3   :  { %140 = vmatprep.subr.bf16.mxu0 %v151_v0  ;;  %v130_v12 = vld [vmem:[%s197_s2] ss:$0 sm:$0xff] }
   0x6   :  { %141 = vmatpush3.bf16.msra.mxu0 %v149_v2 }
   0x8   :  { %v22_v4 = vld [vmem:[#allocation2] sm:$0xff]  ;;  %v23_v8 = vld [vmem:[#allocation2 + $0x8] sm:$0xff] }
   0x9   :  { %143 = vmatmul.mubr.msk.bf16.vlgmr.msra.gmra.mxu0 %vm47_vm2, %v150_v3 }
  0xc9   :  { %v85_v5 = vpop.f32.mrf.mxu0 }
  0xca   :  { %v92_v6 = vadd.f32 %v85_v5, %v22_v4 }
  0xcb   :  { %v144_v7 = vpop.f32.mrf.mxu0 }
  0xcc   :  { %95 = vst.msk [vmem:[#allocation2] sm:$0xff] %vm19_vm0, %v92_v6 }
  0xcd   :  { %v88_v9 = vpop.f32.mrf.mxu0 }
  0xce   :  { %v93_v10 = vadd.f32 %v88_v9, %v23_v8 }
  0xcf   :  { %v145_v11 = vpop.f32.mrf.mxu0 }
  0xd0   :  { %96 = vst.msk [vmem:[#allocation2 + $0x8] sm:$0xff] %vm19_vm0, %v93_v10 }
  0xd3   :  { %v100_v13 = vld [vmem:[#allocation2] sm:$0xff] }
  0xd4   :  { %v109_v14 = vadd.f32 %v130_v12, %v100_v13 }
  0xd6   :  { %v133_v15 = vpack.c.bf16 %v109_v14, %v109_v14 }
  0xd7   :  { %v101_v16 = vld [vmem:[#allocation2 + $0x8] sm:$0xff] }
  0xd8   :  { %120 = vst.msk [vmem:[%s198_s3] sm:$0xf] %vm119_vm3, %v133_v15  ;;  %v110_v17 = vadd.f32 %v130_v12, %v101_v16 }
  0xda   :  { %v134_v18 = vpack.c.bf16 %v110_v17, %v110_v17 }
  0xdc   :  { %121 = vst.msk [vmem:[%s198_s3 + $0x4] sm:$0xf] %vm119_vm3, %v134_v18 }

// kernel: multi_head_attention.3
= control target key start
LH: loop header
LB: loop body
LE: loop exit
PB: predicated region body
PF: predicated region fallthrough
CT: control target
= control target key end

     0   :  { %11 = vsyncpa [#allocation6], 0  ;;  %s2002_s0 = inlined_call_operand.vmem [shape: bf16[3,2,4,8,8], index: 0, kind: input, shape index: {}, may-alias: {0,1,2}]   ;;  %s2003_s1 = inlined_call_operand.vmem [shape: bf16[3,2,4,8,8], index: 1, kind: input, shape index: {}, may-alias: {0,1,2}]   ;;  %s2004_s2 = inlined_call_operand.vmem [shape: bf16[3,2,4,8,8], index: 2, kind: input, shape index: {}, may-alias: {0,1,2}]   ;;  %s2005_s3 = inlined_call_operand.vmem [shape: s8[1,8,8], index: 3, kind: input, shape index: {}]   ;;  %s2006_s4 = inlined_call_operand.vmem [shape: bf16[4,8,32], index: 4, kind: input, shape index: {}]   ;;  %s2007_s5 = inlined_call_operand.vmem [shape: f32[1,32], index: 5, kind: input, shape index: {}]   ;;  %s2008_s6 = inlined_call_operand.hbm [shape: f32[2,8,32], index: 6, kind: output, shape index: {}]  }
   0x1   :  { %13 = vsyncpa [#allocation6 + $0x1], 0  ;;  %s1690_s21 = smov 0   ;;  %s1692_s22 = smov 0  }
   0x2   :  { %s1694_s23 = smov 0   ;;  %s1696_s24 = smov 0  }
   0x3   :  { %s1698_s25 = smov 0   ;;  %s1700_s26 = smov 0  }
   0x4 LB: > { %s1347_s27 = sadd.s32 4294967295, %s1648_s26   ;;  %s1348_s28 = sadd.s32 4294967294, %s1648_s26   ;;  %s1648_s26 = sphi %s1700_s26, %s19_s26   ;;  %s1644_s25 = sphi %s1698_s25, %s2017_s25   ;;  %s1640_s24 = sphi %s1696_s24, %s2016_s24   ;;  %s1636_s23 = sphi %s1694_s23, %s2015_s23   ;;  %s1632_s22 = sphi %s1692_s22, %s2014_s22   ;;  %s1628_s21 = sphi %s1690_s21, %s2013_s21  }
   0x5   : > { %s38_s29 = sadd.s32 1, %s1644_s25  ;;  %s201_s30 = sadd.s32 1, %s1636_s23 }
   0x6   : > { %p40_p0 = scmp.ge.s32.totalorder %s38_s29, 2  ;;  %p211_p1 = scmp.ne.s32.totalorder %s1636_s23, %s1632_s22 }
   0x7   : > { %p212_p2 = scmp.eq.s32.totalorder %s1347_s27, 1  ;;  %p217_p3 = scmp.ne.s32.totalorder %s1632_s22, %s1628_s21 }
   0x8   : > { %s2019_s29 = smov (%p40_p0, %s38_s29), 0  ;;  %p218_p5 = scmp.eq.s32.totalorder %s1348_s28, 1 }
   0x9   : > { %p1730_p4 = por %p212_p2, %p211_p1  ;;  %s196_s8 = ssub.s32 %s1644_s25, %s2019_s29 }
   0xa   : > { %p1352_p6 = scmp.ge.s32.totalorder %s1648_s26, 1  ;;  %p199_p7 = scmp.eq.s32.totalorder %s196_s8, 0 }
   0xb   : > { %p1737_p8 = por %p218_p5, %p217_p3  ;;  %p287_p9 = scmp.lt.s32.totalorder %s1648_s26, 3 }
   0xc   : > { %s1743_s10 = scalar_select %p199_p7, %s1636_s23, %s201_s30  }
   0xd   : > { %p288_p10 = pnand %p1352_p6, %p287_p9 }
   0xe   : > { %p345_p11 = scmp.lt.s32.totalorder (!%p288_p10), %s1640_s24, 1  ;;  %s342_s14 = sand.u32 (!%p288_p10), 1, %s1632_s22  }
   0xf   : > { %291 = sbr.rel (%p288_p10) target bundleno = 1047 (0x417), region = 44  ;;  %s1353_s17 = sshll.u32 (!%p288_p10), %s342_s14, 3 }
  0x14   : > { %vm394_vm0 = vcmask 64512   ;;  %v1650_v0 = vmov 0.0   ;;  %s346_s11 = scalar_select %p345_p11, %s1640_s24, 1  ;;  %vm1651_vm1 = vmmov 0   ;;  %v1652_v13 = vmov 0  }
  0x15   : > { %1415 = vmatprep.subr.bf16.mxu0 %v1650_v0  ;;  %395 = vst.msk [vmem:[#allocation4] sm:$0xff] %vm394_vm0, %v1650_v0  ;;  %396 = vst.msk [vmem:[#allocation4 + $0x8] sm:$0xff] %vm394_vm0, %v1650_v0  ;;  %1421 = vmatprep.subr.bf16.mxu1 %v1650_v0  ;;  %vm385_vm2 = vcmask 7168   ;;  %v1653_v14 = vmov -inf   ;;  %v411_v15 = vld [vmem:[%s2005_s3] sm:$0x3] }
  0x16   : > { %397 = vst.msk [vmem:[#allocation4 + $0x10] sm:$0xff] %vm394_vm0, %v1650_v0  ;;  %398 = vst.msk [vmem:[#allocation4 + $0x18] sm:$0xff] %vm394_vm0, %v1650_v0  ;;  %1417 = vmatprep.mubr.msk.bf16.mxu0 %vm1651_vm1, %v1650_v0  ;;  %1423 = vmatprep.mubr.msk.bf16.mxu1 %vm1651_vm1, %v1650_v0  ;;  %s1761_s12 = sshll.u32 %s346_s11, 4  ;;  %vm412_vm3 = vnez %v411_v15  ;;  %vm735_vm5 = vcmask 1043456   ;;  %vm979_vm6 = vcmask 261120  }
  0x17   : > { %s1275_s15 = scalar_lea.vmem %s2003_s1, %s1761_s12  ;;  %s352_s18 = scalar_lea.vmem %s2002_s0, %s1761_s12  ;;  %1546 = vset.pattern.permute.xlu0 %v1652_v13  ;;  %1547 = vset.pattern.permute.xlu1 %v1652_v13  ;;  %386 = vst.msk [vmem:[#allocation2] sm:$0xff] %vm385_vm2, %v1653_v14  ;;  %387 = vst.msk [vmem:[#allocation2 + $0x8] sm:$0xff] %vm385_vm2, %v1653_v14  ;;  %v598_v16 = vsel %vm412_vm3, 16843009, %v1652_v13 }
  0x18   : > { %v1360_v1 = vld [vmem:[%s1275_s15 + $0x20] sm:$0xf]  ;;  %v1361_v2 = vld [vmem:[%s1275_s15 + $0x24] sm:$0xf]  ;;  %v1362_v5 = vld [vmem:[%s1275_s15 + $0x28] sm:$0xf]  ;;  %v599_v17 = vunpack.c.0.s8 %v598_v16  ;;  %s1862_s30 = scalar_lea.vmem %s2004_s2, %s1761_s12 }
  0x19   : > { %v418_v3 = vsel %vm394_vm0, %v1360_v1, 0  ;;  %v464_v4 = vsel %vm394_vm0, %v1361_v2, 0  ;;  %v1363_v6 = vld [vmem:[%s1275_s15 + $0x2c] sm:$0xf]  ;;  %v399_v7 = vld [vmem:[%s352_s18] sm:$0xf] }
  0x1a   : > { %1416 = vmatpush3.bf16.xpose.msra.mxu0 %v418_v3  ;;  %1422 = vmatpush3.bf16.xpose.msra.mxu1 %v464_v4  ;;  %v400_v8 = vld [vmem:[%s352_s18 + $0x4] sm:$0xf]  ;;  %v510_v9 = vsel %vm394_vm0, %v1362_v5, 0  ;;  %v556_v10 = vsel %vm394_vm0, %v1363_v6, 0  ;;  %v401_v11 = vld [vmem:[%s352_s18 + $0x8] sm:$0xf] }
  0x1b   : > { %1427 = vmatprep.subr.bf16.mxu0 %v1650_v0  ;;  %1433 = vmatprep.subr.bf16.mxu1 %v1650_v0  ;;  %v402_v12 = vld [vmem:[%s352_s18 + $0xc] sm:$0xf]  ;;  %388 = vst.msk [vmem:[#allocation2 + $0x10] sm:$0xff] %vm385_vm2, %v1653_v14  ;;  %389 = vst.msk [vmem:[#allocation2 + $0x18] sm:$0xff] %vm385_vm2, %v1653_v14  ;;  %vm1806_vm4 = vcmp.ne.s32.totalorder %v599_v17, 0  ;;  %s1921_s18 = scalar_lea.vmem [#allocation5], %s1353_s17 }
  0x1c   : > { %390 = vst.msk [vmem:[#allocation3] sm:$0xff] %vm385_vm2, %v1650_v0  ;;  %391 = vst.msk [vmem:[#allocation3 + $0x8] sm:$0xff] %vm385_vm2, %v1650_v0  ;;  %v1364_v58 = vld [vmem:[%s1862_s30 + $0x40] sm:$0xf]  ;;  %v1365_v61 = vld [vmem:[%s1862_s30 + $0x44] sm:$0xf] }
  0x1d   : > { %392 = vst.msk [vmem:[#allocation3 + $0x10] sm:$0xff] %vm385_vm2, %v1650_v0  ;;  %393 = vst.msk [vmem:[#allocation3 + $0x18] sm:$0xff] %vm385_vm2, %v1650_v0  ;;  %v737_v60 = vsel %vm735_vm5, %v1364_v58, 0  ;;  %v783_v62 = vsel %vm735_vm5, %v1365_v61, 0  ;;  %v1367_v17 = vld [vmem:[%s1862_s30 + $0x4c] sm:$0xf] }
  0x1e   : > { %v1825_v43 = vld [vmem:[#allocation2] sm:$0xff]  ;;  %v1830_v46 = vld [vmem:[#allocation2 + $0x8] sm:$0xff]  ;;  %s1210_s8 = sshll.u32 %s1921_s18, 4  ;;  %s1196_s15 = scalar_lea.sflag [#allocation6], %s342_s14  ;;  %s1211_s8 = int_to_ptr.vmem [resolvable:$true] %s1210_s8 }
  0x1f   : > { %s1572_s16 = scalar_lea.vmem %s1211_s8, 128  ;;  %s1654_s17 = smov [#allocation5]  }
  0x20   : > { %p1573_p12 = scmp.ne.s32.totalorder %s1211_s8, %s1572_s16  ;;  %s1576_s19 = sshll.u32 %s1654_s17, 4  ;;  %s1577_s19 = int_to_ptr.vmem [resolvable:$false] %s1576_s19 }
  0x21   : > { %1418 = vmatmul.mubr.msk.bf16.vlgmr.msra.gmra.mxu0 %vm394_vm0, %v399_v7  ;;  %1424 = vmatmul.mubr.msk.bf16.vlgmr.msra.gmra.mxu1 %vm394_vm0, %v400_v8  ;;  %p1579_p1 = scmp.lt.s32.totalorder %s1211_s8, %s1577_s19 }
  0x22   : > { %1428 = vmatpush3.bf16.xpose.msra.mxu0 %v510_v9  ;;  %1434 = vmatpush3.bf16.xpose.msra.mxu1 %v556_v10  ;;  %v1840_v50 = vld [vmem:[#allocation2 + $0x10] sm:$0xff]  ;;  %v1850_v54 = vld [vmem:[#allocation2 + $0x18] sm:$0xff]  ;;  %p1574_p13 = pnand %p1573_p12, %p1730_p4 }
  0x23   : > { %1429 = vmatprep.mubr.msk.bf16.mxu0 %vm1651_vm1, %v1650_v0  ;;  %1435 = vmatprep.mubr.msk.bf16.mxu1 %vm1651_vm1, %v1650_v0 }
  0x24   : > { %1439 = vmatprep.subr.bf16.mxu0 %v1650_v0  ;;  %1445 = vmatprep.subr.bf16.mxu1 %v1650_v0  ;;  %p1575_p0 = pneg %p1574_p13 }
  0x29   : > { %1430 = vmatmul.mubr.msk.bf16.vlgmr.msra.gmra.mxu0 %vm394_vm0, %v401_v11  ;;  %1436 = vmatmul.mubr.msk.bf16.vlgmr.msra.gmra.mxu1 %vm394_vm0, %v402_v12  ;;  %v1366_v12 = vld [vmem:[%s1862_s30 + $0x48] sm:$0xf]  ;;  %s1385_s30 = sshll.u32 %s1640_s24, 7  ;;  %s1578_s24 = scalar_lea.vmem %s1577_s19, 256 }
  0x2a   : > { %1441 = vmatprep.mubr.msk.bf16.mxu0 %vm1651_vm1, %v1650_v0  ;;  %1447 = vmatprep.mubr.msk.bf16.mxu1 %vm1651_vm1, %v1650_v0  ;;  %v829_v16 = vsel %vm735_vm5, %v1366_v12, 0  ;;  %s1208_s13 = scalar_lea.hbm %s2008_s6, %s1385_s30  ;;  %p1580_p2 = scmp.lt.s32.totalorder %s1578_s24, %s1572_s16 }
  0x2b   : > { %1440 = vmatpush3.bf16.msra.mxu0 %v737_v60  ;;  %1446 = vmatpush3.bf16.msra.mxu1 %v783_v62  ;;  %v1378_v62 = vld [vmem:[%s2006_s4 + $0x4] sm:$0xf] }
  0x2c   : > { %1451 = vmatprep.subr.bf16.mxu0 %v1650_v0  ;;  %1457 = vmatprep.subr.bf16.mxu1 %v1650_v0  ;;  %p1581_p3 = por %p1580_p2, %p1579_p1 }
  0x2e   : > { %p1582_p5 = pnand %p1581_p3, %p1575_p0 }
  0xe1   : > { %v454_v19 = vpop.f32.mrf.mxu0  ;;  %v500_v20 = vpop.f32.mrf.mxu1 }
  0xe2   : > { %v603_v21 = vsel %vm1806_vm4, -1e+09, %v454_v19  ;;  %v1814_v22 = vsel %vm1806_vm4, -1e+09, %v500_v20 }
  0xe3   : > { %v1419_v23 = vpop.f32.mrf.mxu0  ;;  %v611_v24 = vsel %vm394_vm0, %v603_v21, -inf  ;;  %v1425_v25 = vpop.f32.mrf.mxu1  ;;  %v614_v27 = vsel %vm394_vm0, %v1814_v22, -inf }
  0xe4   : > { %612 = vmax.xlane.f32.xlu0 %v611_v24 }
  0xe5   : > { %v457_v26 = vpop.f32.mrf.mxu0  ;;  %v503_v28 = vpop.f32.mrf.mxu1 }
  0xe7   : > { %v1420_v29 = vpop.f32.mrf.mxu0  ;;  %v1426_v30 = vpop.f32.mrf.mxu1 }
  0xe8   : > { %615 = vmax.xlane.f32.xlu0 %v614_v27 }
  0xe9   : > { %v546_v31 = vpop.f32.mrf.mxu0  ;;  %v592_v32 = vpop.f32.mrf.mxu1 }
  0xea   : > { %v605_v33 = vsel %vm1806_vm4, -1e+09, %v546_v31  ;;  %v606_v34 = vsel %vm1806_vm4, -1e+09, %v592_v32 }
  0xeb   : > { %v617_v35 = vsel %vm394_vm0, %v605_v33, -inf  ;;  %v1431_v36 = vpop.f32.mrf.mxu0  ;;  %v1437_v37 = vpop.f32.mrf.mxu1  ;;  %v620_v38 = vsel %vm394_vm0, %v606_v34, -inf }
  0xec   : > { %618 = vmax.xlane.f32.xlu1 %v617_v35  ;;  %v671_v35 = vld [vmem:[#allocation3] sm:$0xff] }
  0xed   : > { %v549_v39 = vpop.f32.mrf.mxu0  ;;  %v595_v40 = vpop.f32.mrf.mxu1 }
  0xef   : > { %v1432_v41 = vpop.f32.mrf.mxu0  ;;  %v1438_v42 = vpop.f32.mrf.mxu1 }
  0xf0   : > { %621 = vmax.xlane.f32.xlu1 %v620_v38  ;;  %v672_v38 = vld [vmem:[#allocation3 + $0x8] sm:$0xff] }
 0x16d   : > { %v613_v44 = vpop.xlane.xlu0 %612 }
 0x16e   : > { %v1828_v45 = vmax.f32 %v1825_v43, %v613_v44 }
 0x170   : > { %v627_v47 = vsub.f32 %v1825_v43, %v1828_v45  ;;  %925 = vst.msk [vmem:[#allocation2] sm:$0xff] %vm385_vm2, %v1828_v45  ;;  %641 = vperm.xlu0 %1546, %v1828_v45   ;;  %v673_v43 = vld [vmem:[#allocation3 + $0x10] sm:$0xff] }
 0x171   : > { %v616_v48 = vpop.xlane.xlu0 %615 }
 0x172   : > { %v1838_v49 = vmax.f32 %v1830_v46, %v616_v48  ;;  %v631_v27 = vmul.f32 1.442695, %v627_v47  ;;  %v674_v47 = vld [vmem:[#allocation3 + $0x18] sm:$0xff] }
 0x174   : > { %v628_v51 = vsub.f32 %v1830_v46, %v1838_v49  ;;  %926 = vst.msk [vmem:[#allocation2 + $0x8] sm:$0xff] %vm385_vm2, %v1838_v49  ;;  %646 = vperm.xlu1 %1547, %v1838_v49  }
 0x175   : > { %v619_v52 = vpop.xlane.xlu1 %618 }
 0x176   : > { %v1848_v53 = vmax.f32 %v1840_v50, %v619_v52  ;;  %v633_v25 = vmul.f32 1.442695, %v628_v51 }
 0x178   : > { %v629_v55 = vsub.f32 %v1840_v50, %v1848_v53  ;;  %927 = vst.msk [vmem:[#allocation2 + $0x10] sm:$0xff] %vm385_vm2, %v1848_v53  ;;  %651 = vperm.xlu1 %1547, %v1848_v53  }
 0x179   : > { %v622_v56 = vpop.xlane.xlu1 %621 }
 0x17a   : > { %v626_v57 = vmax.f32 %v1850_v54, %v622_v56 }
 0x17c   : > { %v630_v59 = vsub.f32 %v1850_v54, %v626_v57  ;;  %928 = vst.msk [vmem:[#allocation2 + $0x18] sm:$0xff] %vm385_vm2, %v626_v57  ;;  %656 = vperm.xlu1 %1547, %v626_v57   ;;  %v984_v57 = vld [vmem:[%s2006_s4] sm:$0xf] }
 0x17d   : > { %v989_v58 = vsel %vm735_vm5, %v984_v57, 0 }
 0x17e   : > { %v637_v30 = vmul.f32 1.442695, %v630_v59 }
 0x1eb   : > { %v642_v63 = vpop.permute.xlu0 %641 }
 0x1ec   : > { %v659_v1 = vsub.f32 %v603_v21, %v642_v63  ;;  %v875_v21 = vsel %vm735_vm5, %v1367_v17, 0  ;;  %v1043_v63 = vsel %vm735_vm5, %v1378_v62, 0  ;;  %v703_v17 = vld [vmem:[#allocation4 + $0x18] sm:$0xff] }
 0x1ee   : > { %v663_v2 = vmul.f32 1.442695, %v659_v1  ;;  %v1376_v1 = vld [vmem:[%s2007_s5] ss:$0 sm:$0xff] }
 0x1ef   : > { %v647_v3 = vpop.permute.xlu1 %646  ;;  %980 = vst.msk [vmem:[%s1921_s18] sm:$0xff] %vm979_vm6, %v1376_v1 }
 0x1f0   : > { %1548 = vpow2.f32 %v663_v2  ;;  %v660_v4 = vsub.f32 %v1814_v22, %v647_v3  ;;  %v700_v2 = vld [vmem:[#allocation4] sm:$0xff] }
 0x1f2   : > { %v665_v5 = vmul.f32 1.442695, %v660_v4 }
 0x1f3   : > { %v652_v6 = vpop.permute.xlu1 %651 }
 0x1f4   : > { %1550 = vpow2.f32 %v665_v5  ;;  %v661_v7 = vsub.f32 %v605_v33, %v652_v6  ;;  %v701_v5 = vld [vmem:[#allocation4 + $0x8] sm:$0xff] }
 0x1f6   : > { %v667_v8 = vmul.f32 1.442695, %v661_v7 }
 0x1f7   : > { %v657_v9 = vpop.permute.xlu1 %656 }
 0x1f8   : > { %1552 = vpow2.f32 %v667_v8  ;;  %v662_v10 = vsub.f32 %v606_v34, %v657_v9  ;;  %v635_v34 = vmul.f32 1.442695, %v629_v55 }
 0x1fa   : > { %v669_v11 = vmul.f32 1.442695, %v662_v10 }
 0x1fc   : > { %1554 = vpow2.f32 %v669_v11 }
 0x1fd   : > { %v1549_v13 = vpop.eup %1548  ;;  %1556 = vpow2.f32 %v633_v25 }
 0x1fe   : > { %v679_v14 = vsel %vm394_vm0, %v1549_v13, 0.0  ;;  %v728_v15 = vpack.c.bf16 %v1549_v13, %v1549_v13  ;;  %1558 = vpow2.f32 %v631_v27 }
 0x1ff   : > { %680 = vadd.xlane.f32.xlu1 %v679_v14  ;;  %1560 = vpow2.f32 %v637_v30 }
 0x200   : > { %1442 = vmatmul.mubr.msk.bf16.vlgmr.msra.gmra.mxu0 %vm394_vm0, %v728_v15  ;;  %1562 = vpow2.f32 %v635_v34 }
 0x201   : > { %v1551_v18 = vpop.eup %1550  ;;  %1452 = vmatpush3.bf16.msra.mxu0 %v829_v16  ;;  %1453 = vmatprep.mubr.msk.bf16.mxu0 %vm1651_vm1, %v1650_v0 }
 0x202   : > { %v682_v19 = vsel %vm394_vm0, %v1551_v18, 0.0  ;;  %v729_v20 = vpack.c.bf16 %v1551_v18, %v1551_v18  ;;  %1463 = vmatprep.subr.bf16.mxu0 %v1650_v0 }
 0x203   : > { %683 = vadd.xlane.f32.xlu0 %v682_v19 }
 0x204   : > { %1448 = vmatmul.mubr.msk.bf16.vlgmr.msra.gmra.mxu1 %vm394_vm0, %v729_v20 }
 0x205   : > { %v1553_v22 = vpop.eup %1552  ;;  %1458 = vmatpush3.bf16.msra.mxu1 %v875_v21  ;;  %1459 = vmatprep.mubr.msk.bf16.mxu1 %vm1651_vm1, %v1650_v0 }
 0x206   : > { %v685_v23 = vsel %vm394_vm0, %v1553_v22, 0.0  ;;  %v730_v24 = vpack.c.bf16 %v1553_v22, %v1553_v22  ;;  %1469 = vmatprep.subr.bf16.mxu1 %v1650_v0 }
 0x207   : > { %686 = vadd.xlane.f32.xlu1 %v685_v23 }
 0x208   : > { %1454 = vmatmul.mubr.msk.bf16.vlgmr.msra.gmra.mxu0 %vm394_vm0, %v730_v24 }
 0x209   : > { %v1555_v26 = vpop.eup %1554  ;;  %1465 = vmatprep.mubr.msk.bf16.mxu0 %vm1651_vm1, %v1650_v0  ;;  %1464 = vmatpush3.bf16.msra.mxu0 %v989_v58  ;;  %v981_v58 = vld [vmem:[%s1921_s18] sm:$0xff] }
 0x20a   : > { %v688_v28 = vsel %vm394_vm0, %v1555_v26, 0.0  ;;  %v731_v29 = vpack.c.bf16 %v1555_v26, %v1555_v26  ;;  %v1557_v31 = vpop.eup %1556  ;;  %1475 = vmatprep.subr.bf16.mxu0 %v1650_v0 }
 0x20b   : > { %689 = vadd.xlane.f32.xlu1 %v688_v28  ;;  %v1559_v32 = vpop.eup %1558  ;;  %v676_v40 = vmul.f32 %v1557_v31, %v672_v38 }
 0x20c   : > { %1460 = vmatmul.mubr.msk.bf16.vlgmr.msra.gmra.mxu1 %vm394_vm0, %v731_v29  ;;  %v1561_v33 = vpop.eup %1560  ;;  %v675_v36 = vmul.f32 %v1559_v32, %v671_v35 }
 0x20d   : > { %1471 = vmatprep.mubr.msk.bf16.mxu1 %vm1651_vm1, %v1650_v0  ;;  %v1563_v41 = vpop.eup %1562  ;;  %v678_v50 = vmul.f32 %v1561_v33, %v674_v47  ;;  %1470 = vmatpush3.bf16.msra.mxu1 %v1043_v63 }
 0x20e   : > { %v677_v45 = vmul.f32 %v1563_v41, %v673_v43  ;;  %1481 = vmatprep.subr.bf16.mxu1 %v1650_v0 }
 0x219   : > { %711 = vperm.xlu0 %1546, %v1557_v31  }
 0x21c   : > { %706 = vperm.xlu1 %1547, %v1559_v32  }
 0x21d   : > { %721 = vperm.xlu0 %1546, %v1561_v33   ;;  %v702_v33 = vld [vmem:[#allocation4 + $0x10] sm:$0xff] }
 0x288   : > { %v681_v37 = vpop.xlane.xlu1 %680 }
 0x289   : > { %v691_v39 = vadd.f32 %v681_v37, %v675_v36 }
 0x28b   : > { %696 = vst.msk [vmem:[#allocation3] sm:$0xff] %vm385_vm2, %v691_v39  ;;  %v1380_v39 = vld [vmem:[%s2006_s4 + $0x8] sm:$0xf] }
 0x28c   : > { %v684_v42 = vpop.xlane.xlu0 %683  ;;  %v1097_v43 = vsel %vm735_vm5, %v1380_v39, 0 }
 0x28d   : > { %v692_v44 = vadd.f32 %v684_v42, %v676_v40 }
 0x28f   : > { %697 = vst.msk [vmem:[#allocation3 + $0x8] sm:$0xff] %vm385_vm2, %v692_v44 }
 0x290   : > { %v687_v46 = vpop.xlane.xlu1 %686 }
 0x291   : > { %v693_v48 = vadd.f32 %v687_v46, %v677_v45 }
 0x292   : > { %v936_v49 = vld [vmem:[#allocation3] sm:$0xff] }
 0x293   : > { %698 = vst.msk [vmem:[#allocation3 + $0x10] sm:$0xff] %vm385_vm2, %v693_v48  ;;  %1564 = vrcp.f32 %v936_v49  ;;  %v1382_v49 = vld [vmem:[%s2006_s4 + $0xc] sm:$0xf] }
 0x294   : > { %v690_v51 = vpop.xlane.xlu1 %689  ;;  %v712_v6 = vpop.permute.xlu0 %711 }
 0x295   : > { %v694_v52 = vadd.f32 %v690_v51, %v678_v50  ;;  %v725_v10 = vmul.f32 %v712_v6, %v701_v5 }
 0x296   : > { %v937_v53 = vld [vmem:[#allocation3 + $0x8] sm:$0xff] }
 0x297   : > { %699 = vst.msk [vmem:[#allocation3 + $0x18] sm:$0xff] %vm385_vm2, %v694_v52  ;;  %1566 = vrcp.f32 %v937_v53  ;;  %v1151_v53 = vsel %vm735_vm5, %v1382_v49, 0 }
 0x298   : > { %v707_v3 = vpop.permute.xlu1 %706  ;;  %v722_v16 = vpop.permute.xlu0 %721 }
 0x299   : > { %v724_v4 = vmul.f32 %v707_v3, %v700_v2  ;;  %v727_v22 = vmul.f32 %v722_v16, %v703_v17 }
 0x29a   : > { %v938_v54 = vld [vmem:[#allocation3 + $0x10] sm:$0xff] }
 0x29b   : > { %1568 = vrcp.f32 %v938_v54 }
 0x29e   : > { %v939_v55 = vld [vmem:[#allocation3 + $0x18] sm:$0xff] }
 0x29f   : > { %1570 = vrcp.f32 %v939_v55 }
 0x2a0   : > { %v1565_v56 = vpop.eup %1564 }
 0x2a1   : > { %946 = vperm.xlu1 %1547, %v1565_v56  }
 0x2a4   : > { %v1567_v59 = vpop.eup %1566 }
 0x2a5   : > { %716 = vperm.xlu1 %1547, %v1563_v41  }
 0x2a8   : > { %v1569_v60 = vpop.eup %1568 }
 0x2a9   : > { %951 = vperm.xlu1 %1547, %v1567_v59  }
 0x2ac   : > { %v1571_v61 = vpop.eup %1570 }
 0x2ad   : > { %956 = vperm.xlu1 %1547, %v1569_v60   ;;  %961 = vperm.xlu0 %1546, %v1571_v61  }
 0x2c0   : > { %v773_v7 = vpop.f32.mrf.mxu0 }
 0x2c1   : > { %v917_v8 = vadd.f32 %v773_v7, %v724_v4 }
 0x2c2   : > { %v1443_v9 = vpop.f32.mrf.mxu0 }
 0x2c3   : > { %921 = vst.msk [vmem:[#allocation4] sm:$0xff] %vm394_vm0, %v917_v8 }
 0x2c4   : > { %v776_v11 = vpop.f32.mrf.mxu0  ;;  %v819_v12 = vpop.f32.mrf.mxu1 }
 0x2c5   : > { %v918_v13 = vadd.f32 %v819_v12, %v725_v10 }
 0x2c6   : > { %v1444_v14 = vpop.f32.mrf.mxu0  ;;  %v1449_v15 = vpop.f32.mrf.mxu1 }
 0x2c7   : > { %922 = vst.msk [vmem:[#allocation4 + $0x8] sm:$0xff] %vm394_vm0, %v918_v13 }
 0x2c8   : > { %v822_v18 = vpop.f32.mrf.mxu1  ;;  %v865_v19 = vpop.f32.mrf.mxu0 }
 0x2ca   : > { %v1450_v20 = vpop.f32.mrf.mxu1  ;;  %v1455_v21 = vpop.f32.mrf.mxu0  ;;  %v932_v31 = vld [vmem:[#allocation4] sm:$0xff] }
 0x2cc   : > { %v868_v23 = vpop.f32.mrf.mxu0  ;;  %v911_v24 = vpop.f32.mrf.mxu1 }
 0x2cd   : > { %v920_v25 = vadd.f32 %v911_v24, %v727_v22 }
 0x2ce   : > { %v1456_v26 = vpop.f32.mrf.mxu0  ;;  %v1461_v27 = vpop.f32.mrf.mxu1  ;;  %v933_v37 = vld [vmem:[#allocation4 + $0x8] sm:$0xff] }
 0x2cf   : > { %924 = vst.msk [vmem:[#allocation4 + $0x18] sm:$0xff] %vm394_vm0, %v920_v25 }
 0x2d0   : > { %v914_v28 = vpop.f32.mrf.mxu1 }
 0x2d2   : > { %v1462_v29 = vpop.f32.mrf.mxu1 }
 0x2d6   : > { %v935_v44 = vld [vmem:[#allocation4 + $0x18] sm:$0xff] }
 0x31c   : > { %v947_v30 = vpop.permute.xlu1 %946 }
 0x31d   : > { %v964_v32 = vmul.f32 %v947_v30, %v932_v31 }
 0x31f   : > { %968 = vst.msk [vmem:[#allocation4] sm:$0xff] %vm394_vm0, %v964_v32 }
 0x320   : > { %v717_v34 = vpop.permute.xlu1 %716 }
 0x321   : > { %v726_v35 = vmul.f32 %v717_v34, %v702_v33 }
 0x323   : > { %v919_v36 = vadd.f32 %v865_v19, %v726_v35 }
 0x324   : > { %v952_v38 = vpop.permute.xlu1 %951 }
 0x325   : > { %923 = vst.msk [vmem:[#allocation4 + $0x10] sm:$0xff] %vm394_vm0, %v919_v36  ;;  %v965_v40 = vmul.f32 %v952_v38, %v933_v37 }
 0x326   : > { %v982_v41 = vld [vmem:[#allocation4] sm:$0xff] }
 0x327   : > { %969 = vst.msk [vmem:[#allocation4 + $0x8] sm:$0xff] %vm394_vm0, %v965_v40  ;;  %v983_v42 = vpack.c.bf16 %v982_v41, %v982_v41 }
 0x328   : > { %v962_v45 = vpop.permute.xlu0 %961  ;;  %v957_v47 = vpop.permute.xlu1 %956 }
 0x329   : > { %v967_v46 = vmul.f32 %v962_v45, %v935_v44  ;;  %1466 = vmatmul.mubr.msk.bf16.vlgmr.msra.gmra.mxu0 %vm394_vm0, %v983_v42 }
 0x32a   : > { %1476 = vmatpush3.bf16.msra.mxu0 %v1097_v43  ;;  %1477 = vmatprep.mubr.msk.bf16.mxu0 %vm1651_vm1, %v1650_v0 }
 0x32b   : > { %971 = vst.msk [vmem:[#allocation4 + $0x18] sm:$0xff] %vm394_vm0, %v967_v46 }
 0x32c   : > { %v934_v48 = vld [vmem:[#allocation4 + $0x10] sm:$0xff] }
 0x32d   : > { %v966_v50 = vmul.f32 %v957_v47, %v934_v48 }
 0x32e   : > { %v1035_v51 = vld [vmem:[#allocation4 + $0x8] sm:$0xff] }
 0x32f   : > { %970 = vst.msk [vmem:[#allocation4 + $0x10] sm:$0xff] %vm394_vm0, %v966_v50  ;;  %v1036_v52 = vpack.c.bf16 %v1035_v51, %v1035_v51 }
 0x331   : > { %1472 = vmatmul.mubr.msk.bf16.vlgmr.msra.gmra.mxu1 %vm394_vm0, %v1036_v52 }
 0x332   : > { %1482 = vmatpush3.bf16.msra.mxu1 %v1151_v53  ;;  %1483 = vmatprep.mubr.msk.bf16.mxu1 %vm1651_vm1, %v1650_v0  ;;  %v1143_v54 = vld [vmem:[#allocation4 + $0x18] sm:$0xff] }
 0x333   : > { %v1144_v57 = vpack.c.bf16 %v1143_v54, %v1143_v54 }
 0x336   : > { %v1089_v55 = vld [vmem:[#allocation4 + $0x10] sm:$0xff] }
 0x337   : > { %v1090_v56 = vpack.c.bf16 %v1089_v55, %v1089_v55 }
 0x339   : > { %1478 = vmatmul.mubr.msk.bf16.vlgmr.msra.gmra.mxu0 %vm394_vm0, %v1090_v56  ;;  %1484 = vmatmul.mubr.msk.bf16.vlgmr.msra.gmra.mxu1 %vm394_vm0, %v1144_v57 }
 0x3e9   : > { %v1025_v59 = vpop.f32.mrf.mxu0 }
 0x3ea   : > { %v1031_v60 = vadd.f32 %v1025_v59, %v981_v58 }
 0x3eb   : > { %v1467_v61 = vpop.f32.mrf.mxu0 }
 0x3ec   : > { %1032 = vst.msk [vmem:[%s1921_s18] sm:$0xff] %vm979_vm6, %v1031_v60 }
 0x3ed   : > { %v1028_v62 = vpop.f32.mrf.mxu0 }
 0x3ef   : > { %v1468_v63 = vpop.f32.mrf.mxu0 }
 0x3f1   : > { %v1079_v1 = vpop.f32.mrf.mxu1 }
 0x3f3   : > { %v1033_v0 = vld [vmem:[%s1921_s18] sm:$0xff]  ;;  %v1473_v2 = vpop.f32.mrf.mxu1 }
 0x3f4   : > { %v1085_v3 = vadd.f32 %v1079_v1, %v1033_v0 }
 0x3f5   : > { %v1082_v4 = vpop.f32.mrf.mxu1 }
 0x3f6   : > { %1086 = vst.msk [vmem:[%s1921_s18] sm:$0xff] %vm979_vm6, %v1085_v3 }
 0x3f7   : > { %v1474_v5 = vpop.f32.mrf.mxu1 }
 0x3f9   : > { %v1133_v6 = vpop.f32.mrf.mxu0  ;;  %v1187_v7 = vpop.f32.mrf.mxu1 }
 0x3fb   : > { %v1479_v8 = vpop.f32.mrf.mxu0  ;;  %v1485_v9 = vpop.f32.mrf.mxu1 }
 0x3fd   : > { %v1087_v10 = vld [vmem:[%s1921_s18] sm:$0xff]  ;;  %v1136_v11 = vpop.f32.mrf.mxu0  ;;  %v1190_v12 = vpop.f32.mrf.mxu1 }
 0x3fe   : > { %v1139_v13 = vadd.f32 %v1133_v6, %v1087_v10 }
 0x3ff   : > { %v1480_v14 = vpop.f32.mrf.mxu0  ;;  %v1486_v15 = vpop.f32.mrf.mxu1 }
 0x400   : > { %1140 = vst.msk [vmem:[%s1921_s18] sm:$0xff] %vm979_vm6, %v1139_v13 }
 0x407   : > { %v1141_v16 = vld [vmem:[%s1921_s18] sm:$0xff] }
 0x408   : > { %v1193_v17 = vadd.f32 %v1187_v7, %v1141_v16 }
 0x40a   : > { %1194 = vst.msk [vmem:[%s1921_s18] sm:$0xff] %vm979_vm6, %v1193_v17 }
 0x40b   : > { %1585 = shalt.err (!%p1582_p5)
}
 0x40c   : > { %s1586_s20 = scalar_lea.hbm %s1208_s13, 128  ;;  %s1590_s27 = scalar_lea.hbm %s2008_s6, 256 }
 0x40d   : > { %p1587_p6 = scmp.ne.s32.totalorder %s1208_s13, %s1586_s20  ;;  %p1591_p10 = scmp.lt.s32.totalorder %s1208_s13, %s2008_s6 }
 0x40e   : > { %p1592_p11 = scmp.lt.s32.totalorder %s1590_s27, %s1586_s20 }
 0x40f   : > { %p1588_p7 = pnand %p1587_p6, %p1730_p4 }
 0x410   : > { %p1593_p12 = por %p1592_p11, %p1591_p10 }
 0x411   : > { %p1589_p9 = pneg %p1588_p7 }
 0x413   : > { %p1594_p13 = pnand %p1593_p12, %p1589_p9 }
 0x415   : > { %1597 = shalt.err (!%p1594_p13)
}
 0x416   : > { %1487 = dma.vmem_to_hbm [thread:$0]  (%p1730_p4), %s1211_s8, 128, %s1208_s13, %s1196_s15  }
 0x417 PF: > { %p1493_p0 = scmp.ge.s32.totalorder %s1648_s26, 2  ;;  %s1222_s11 = sand.u32 1, %s1628_s21  }
 0x418   : > { %s1223_s12 = scalar_lea.sflag [#allocation6], %s1222_s11 }
 0x419   : > { %p1490_p1 = pnand %p1493_p0, %p1737_p8 }
 0x41b   : > { %p1491_p2 = pneg %p1490_p1 }
 0x41d   : > { %1623 = dma.done.wait (%p1491_p2), %s1223_s12, 128  }
 0x41e   : > { %1625 = vsyncadd (%p1491_p2), %s1223_s12, 4294967168  ;;  %s19_s26 = sadd.s32 1, %s1648_s26   ;;  %s2013_s21 = smov %s1632_s22 }
 0x41f   : > { %p16_p3 = scmp.ge.s32.totalorder %s19_s26, 4   ;;  %s2014_s22 = smov %s1636_s23 }
 0x420   : > { %s2015_s23 = smov %s1743_s10  ;;  %s2016_s24 = smov %s1644_s25 }
 0x421   : > { %s2017_s25 = smov %s2019_s29  ;;  %18 = sbr.rel (!%p16_p3) target bundleno = 4 (0x4), region = 102 }
 0x426   :  { %1228 = vsyncpa [#allocation6], 1 }
 0x427   :  { %1230 = vsyncpa [#allocation6 + $0x1], 1 }

</bundles_post_ra>
